<compile_context>
chip_gen: v7x
topology: tpu7x:2x2x1
jax: 0.10.0
libtpu: 0.0.40
codegen_flags: <defaults>
</compile_context>

<pallas_src>
import jax
import jax.numpy as jnp
from jax.experimental import pallas as pl
from jax.experimental.pallas import tpu as pltpu

H1, H2 = 256, 128      # hidden widths of the module
OUT_PAD = 128          # lane-dense padded output width (assumes action_dim <= 128)


def _round_up(n, m):
    return ((n + m - 1) // m) * m


def _mlp_kernel(x_ref, w1_ref, b1_ref, w2_ref, b2_ref, w3_ref, b3_ref, o_ref):
    # Layer 1: (TB, S)bf16 @ (S, 256)bf16 -> f32 acc, +bias, f32 tanh.
    h1 = jnp.tanh(
        jnp.dot(x_ref[...], w1_ref[...], preferred_element_type=jnp.float32)
        + b1_ref[...]
    )
    # Layer 2: (TB, 256) @ (256, 128) -> f32 acc, +bias, f32 tanh.
    h2 = jnp.tanh(
        jnp.dot(h1.astype(jnp.bfloat16), w2_ref[...],
                preferred_element_type=jnp.float32)
        + b2_ref[...]
    )
    # Layer 3: (TB, 128) @ (128, 128-padded) -> f32 acc, +bias, no activation.
    o_ref[...] = (
        jnp.dot(h2.astype(jnp.bfloat16), w3_ref[...],
                preferred_element_type=jnp.float32)
        + b3_ref[...]
    ).astype(o_ref.dtype)


def less_dq_network_forward(x, params, action_dim, tb=256):
    """Fused MLP forward.  x: (B, state_dim) f32.  Returns (B, action_dim) f32."""
    w1, b1, w2, b2, w3, b3 = params
    B, S = x.shape

    # Batch tile: multiple of 8 sublanes; don't over-tile tiny batches.
    tb = min(tb, _round_up(B, 8))
    Bp = _round_up(B, tb)
    x_pad = jnp.pad(x, ((0, Bp - B), (0, 0))).astype(jnp.bfloat16)

    out = pl.pallas_call(
        _mlp_kernel,
        out_shape=jax.ShapeDtypeStruct((Bp, OUT_PAD), jnp.float32),
        grid=(Bp // tb,),
        in_specs=[
            pl.BlockSpec((tb, S), lambda i: (i, 0)),        # x tile streams
            pl.BlockSpec((S, H1), lambda i: (0, 0)),        # weights resident
            pl.BlockSpec((1, H1), lambda i: (0, 0)),
            pl.BlockSpec((H1, H2), lambda i: (0, 0)),
            pl.BlockSpec((1, H2), lambda i: (0, 0)),
            pl.BlockSpec((H2, OUT_PAD), lambda i: (0, 0)),
            pl.BlockSpec((1, OUT_PAD), lambda i: (0, 0)),
        ],
        out_specs=pl.BlockSpec((tb, OUT_PAD), lambda i: (i, 0)),
        compiler_params=pltpu.CompilerParams(
            dimension_semantics=("parallel",)),             # shard tiles on v7x's 2 TCs
    )(x_pad, w1, b1, w2, b2, w3, b3)

    return out[:B, :action_dim]


def init_params(key, state_dim, action_dim):
    """PyTorch nn.Linear default init: U(-1/sqrt(fan_in), 1/sqrt(fan_in)).
    Weights stored as (in, out) in bf16; biases f32; layer-3 zero-padded to
    OUT_PAD lanes for a lane-dense output."""
    dims = [(state_dim, H1), (H1, H2), (H2, action_dim)]
    raw = []
    for fan_in, fan_out in dims:
        key, kw, kb = jax.random.split(key, 3)
        bound = 1.0 / float(fan_in) ** 0.5
        w = jax.random.uniform(kw, (fan_in, fan_out), jnp.float32, -bound, bound)
        b = jax.random.uniform(kb, (1, fan_out), jnp.float32, -bound, bound)
        raw += [w, b]
    w1, b1, w2, b2, w3, b3 = raw
    w3 = jnp.pad(w3, ((0, 0), (0, OUT_PAD - action_dim)))
    b3 = jnp.pad(b3, ((0, 0), (0, OUT_PAD - action_dim)))
    return (w1.astype(jnp.bfloat16), b1,
            w2.astype(jnp.bfloat16), b2,
            w3.astype(jnp.bfloat16), b3)


def _reference_forward(x, params, action_dim):
    """Pure-JAX f32 reference (weights upcast from bf16)."""
    w1, b1, w2, b2, w3, b3 = params
    xf = x.astype(jnp.float32)
    h1 = jnp.tanh(xf @ w1.astype(jnp.float32) + b1)
    h2 = jnp.tanh(h1 @ w2.astype(jnp.float32) + b2)
    out = h2 @ w3.astype(jnp.float32) + b3
    return out[:, :action_dim]


if __name__ == "__main__":
    key = jax.random.PRNGKey(0)
    key, kx1, kx2 = jax.random.split(key, 3)

    # Small, module-consistent shapes: state_dim=32, action_dim=4.
    STATE_DIM, ACTION_DIM = 32, 4
    params = init_params(key, STATE_DIM, ACTION_DIM)

    # Case 1: single small batch (single tile).
    B1 = 8
    x1 = jax.random.normal(kx1, (B1, STATE_DIM), jnp.float32)
    out1 = jax.block_until_ready(less_dq_network_forward(x1, params, ACTION_DIM))
    ref1 = _reference_forward(x1, params, ACTION_DIM)
    assert out1.shape == (B1, ACTION_DIM), out1.shape
    assert jnp.allclose(out1, ref1, atol=2e-2, rtol=2e-2), "mismatch vs reference (B=8)"

    # Case 2: batch not divisible by the tile, multi-tile grid (exercises
    # the batch grid, weight residency, and tail padding).
    B2 = 20
    x2 = jax.random.normal(kx2, (B2, STATE_DIM), jnp.float32)
    out2 = jax.block_until_ready(less_dq_network_forward(x2, params, ACTION_DIM, tb=8))
    ref2 = _reference_forward(x2, params, ACTION_DIM)
    assert out2.shape == (B2, ACTION_DIM), out2.shape
    assert jnp.allclose(out2, ref2, atol=2e-2, rtol=2e-2), "mismatch vs reference (B=20)"

    print("KERNEL_OK")
</pallas_src>

<mosaic_0001>
module attributes {stable_mosaic.version = 11 : i64} {
  func.func @_mlp_kernel(%arg0: i32, %arg1: memref<8x32xbf16, #tpu.memory_space<vmem>>, %arg2: memref<32x256xbf16, #tpu.memory_space<vmem>>, %arg3: memref<1x256xf32, #tpu.memory_space<vmem>>, %arg4: memref<256x128xbf16, #tpu.memory_space<vmem>>, %arg5: memref<1x128xf32, #tpu.memory_space<vmem>>, %arg6: memref<128x128xbf16, #tpu.memory_space<vmem>>, %arg7: memref<1x128xf32, #tpu.memory_space<vmem>>, %arg8: memref<8x128xf32, #tpu.memory_space<vmem>>) attributes {dimension_semantics = [#tpu.dimension_semantics<parallel>], iteration_bounds = array<i64: 1>, scalar_prefetch = 0 : i64, scratch_operands = 0 : i64, tpu.core_type = #tpu.core_type<tc>, window_params = [{transform_indices = @transform_0, window_bounds = array<i64: 8, 32>}, {pipeline_mode = #tpu.pipeline_mode<synchronous>, transform_indices = @transform_1, window_bounds = array<i64: 32, 256>}, {pipeline_mode = #tpu.pipeline_mode<synchronous>, transform_indices = @transform_2, window_bounds = array<i64: 1, 256>}, {pipeline_mode = #tpu.pipeline_mode<synchronous>, transform_indices = @transform_3, window_bounds = array<i64: 256, 128>}, {pipeline_mode = #tpu.pipeline_mode<synchronous>, transform_indices = @transform_4, window_bounds = array<i64: 1, 128>}, {pipeline_mode = #tpu.pipeline_mode<synchronous>, transform_indices = @transform_5, window_bounds = array<i64: 128, 128>}, {pipeline_mode = #tpu.pipeline_mode<synchronous>, transform_indices = @transform_6, window_bounds = array<i64: 1, 128>}, {transform_indices = @transform_7, window_bounds = array<i64: 8, 128>}]} {
    %c0 = arith.constant 0 : index
    %c0_0 = arith.constant 0 : index
    %0 = vector.load %arg1[%c0, %c0_0] : memref<8x32xbf16, #tpu.memory_space<vmem>>, vector<8x32xbf16>
    %c0_1 = arith.constant 0 : index
    %c0_2 = arith.constant 0 : index
    %1 = vector.load %arg2[%c0_1, %c0_2] : memref<32x256xbf16, #tpu.memory_space<vmem>>, vector<32x256xbf16>
    %cst = arith.constant dense<0.000000e+00> : vector<8x256xf32>
    %2 = tpu.matmul %0, %1, %cst {dimension_numbers = #tpu.dot_dimension_numbers<[1], [0], [0], [1], [0, 0, 1, 1], [], []>} : vector<8x32xbf16>, vector<32x256xbf16>, vector<8x256xf32> -> vector<8x256xf32>
    %c0_3 = arith.constant 0 : index
    %c0_4 = arith.constant 0 : index
    %3 = vector.load %arg3[%c0_3, %c0_4] : memref<1x256xf32, #tpu.memory_space<vmem>>, vector<1x256xf32>
    %4 = vector.broadcast %3 : vector<1x256xf32> to vector<8x256xf32>
    %5 = arith.addf %2, %4 : vector<8x256xf32>
    %6 = math.tanh %5 : vector<8x256xf32>
    %7 = arith.truncf %6 : vector<8x256xf32> to vector<8x256xbf16>
    %c0_5 = arith.constant 0 : index
    %c0_6 = arith.constant 0 : index
    %8 = vector.load %arg4[%c0_5, %c0_6] : memref<256x128xbf16, #tpu.memory_space<vmem>>, vector<256x128xbf16>
    %cst_7 = arith.constant dense<0.000000e+00> : vector<8x128xf32>
    %9 = tpu.matmul %7, %8, %cst_7 {dimension_numbers = #tpu.dot_dimension_numbers<[1], [0], [0], [1], [0, 0, 1, 1], [], []>} : vector<8x256xbf16>, vector<256x128xbf16>, vector<8x128xf32> -> vector<8x128xf32>
    %c0_8 = arith.constant 0 : index
    %c0_9 = arith.constant 0 : index
    %10 = vector.load %arg5[%c0_8, %c0_9] : memref<1x128xf32, #tpu.memory_space<vmem>>, vector<1x128xf32>
    %11 = vector.broadcast %10 : vector<1x128xf32> to vector<8x128xf32>
    %12 = arith.addf %9, %11 : vector<8x128xf32>
    %13 = math.tanh %12 : vector<8x128xf32>
    %14 = arith.truncf %13 : vector<8x128xf32> to vector<8x128xbf16>
    %c0_10 = arith.constant 0 : index
    %c0_11 = arith.constant 0 : index
    %15 = vector.load %arg6[%c0_10, %c0_11] : memref<128x128xbf16, #tpu.memory_space<vmem>>, vector<128x128xbf16>
    %cst_12 = arith.constant dense<0.000000e+00> : vector<8x128xf32>
    %16 = tpu.matmul %14, %15, %cst_12 {dimension_numbers = #tpu.dot_dimension_numbers<[1], [0], [0], [1], [0, 0, 1, 1], [], []>} : vector<8x128xbf16>, vector<128x128xbf16>, vector<8x128xf32> -> vector<8x128xf32>
    %c0_13 = arith.constant 0 : index
    %c0_14 = arith.constant 0 : index
    %17 = vector.load %arg7[%c0_13, %c0_14] : memref<1x128xf32, #tpu.memory_space<vmem>>, vector<1x128xf32>
    %18 = vector.broadcast %17 : vector<1x128xf32> to vector<8x128xf32>
    %19 = arith.addf %16, %18 : vector<8x128xf32>
    %c0_15 = arith.constant 0 : index
    %c0_16 = arith.constant 0 : index
    %20 = vector.load %arg8[%c0_15, %c0_16] : memref<8x128xf32, #tpu.memory_space<vmem>>, vector<8x128xf32>
    tpu.vector_store %arg8[%c0_15, %c0_16], %19 {strides = array<i32>} : memref<8x128xf32, #tpu.memory_space<vmem>>, vector<8x128xf32>,
    return
  }
  func.func @transform_0(%arg0: i32) -> (i32, i32) {
    %c0_i32 = arith.constant 0 : i32
    %c0_i32_0 = arith.constant 0 : i32
    return %arg0, %c0_i32 : i32, i32
  }
  func.func @transform_1(%arg0: i32) -> (i32, i32) {
    %c0_i32 = arith.constant 0 : i32
    %c0_i32_0 = arith.constant 0 : i32
    %c0_i32_1 = arith.constant 0 : i32
    return %c0_i32, %c0_i32_0 : i32, i32
  }
  func.func @transform_2(%arg0: i32) -> (i32, i32) {
    %c0_i32 = arith.constant 0 : i32
    %c0_i32_0 = arith.constant 0 : i32
    %c0_i32_1 = arith.constant 0 : i32
    return %c0_i32, %c0_i32_0 : i32, i32
  }
  func.func @transform_3(%arg0: i32) -> (i32, i32) {
    %c0_i32 = arith.constant 0 : i32
    %c0_i32_0 = arith.constant 0 : i32
    %c0_i32_1 = arith.constant 0 : i32
    return %c0_i32, %c0_i32_0 : i32, i32
  }
  func.func @transform_4(%arg0: i32) -> (i32, i32) {
    %c0_i32 = arith.constant 0 : i32
    %c0_i32_0 = arith.constant 0 : i32
    %c0_i32_1 = arith.constant 0 : i32
    return %c0_i32, %c0_i32_0 : i32, i32
  }
  func.func @transform_5(%arg0: i32) -> (i32, i32) {
    %c0_i32 = arith.constant 0 : i32
    %c0_i32_0 = arith.constant 0 : i32
    %c0_i32_1 = arith.constant 0 : i32
    return %c0_i32, %c0_i32_0 : i32, i32
  }
  func.func @transform_6(%arg0: i32) -> (i32, i32) {
    %c0_i32 = arith.constant 0 : i32
    %c0_i32_0 = arith.constant 0 : i32
    %c0_i32_1 = arith.constant 0 : i32
    return %c0_i32, %c0_i32_0 : i32, i32
  }
  func.func @transform_7(%arg0: i32) -> (i32, i32) {
    %c0_i32 = arith.constant 0 : i32
    %c0_i32_0 = arith.constant 0 : i32
    return %arg0, %c0_i32 : i32, i32
  }
}

</mosaic_0001>

<bundles_post_ra>
// kernel: tpu_custom_call.1
= control target key start
LH: loop header
LB: loop body
LE: loop exit
PB: predicated region body
PF: predicated region fallthrough
CT: control target
= control target key end

     0   :  { %12 = vsyncpa [#allocation3], 0  ;;  %s842_s0 = inlined_call_operand.hbm [shape: bf16[8,32], index: 0, kind: input, shape index: {}]   ;;  %s843_s1 = inlined_call_operand.hbm [shape: bf16[32,256], index: 1, kind: input, shape index: {}]   ;;  %s844_s2 = inlined_call_operand.vmem [shape: f32[1,256], index: 2, kind: input, shape index: {}]   ;;  %s845_s3 = inlined_call_operand.hbm [shape: bf16[256,128], index: 3, kind: input, shape index: {}]   ;;  %s846_s4 = inlined_call_operand.vmem [shape: f32[1,128], index: 4, kind: input, shape index: {}]   ;;  %s847_s5 = inlined_call_operand.hbm [shape: bf16[128,128], index: 5, kind: input, shape index: {}]   ;;  %s848_s6 = inlined_call_operand.vmem [shape: f32[1,128], index: 6, kind: input, shape index: {}]   ;;  %s849_s7 = inlined_call_operand.hbm [shape: f32[8,128], index: 7, kind: output, shape index: {}]  }
   0x1   :  { %13 = vsyncpa [#allocation6], 0 }
   0x2   :  { %14 = vsyncpa [#allocation9], 0 }
   0x3   :  { %15 = vsyncpa [#allocation4], 0  ;;  %s721_s24 = smov [#allocation5]   ;;  %s603_s28 = scalar_lea.hbm %s843_s1, 512 }
   0x4   :  { %s31_s25 = sshll.u32 %s721_s24, 4  ;;  %p604_p0 = scmp.ne.s32.totalorder %s843_s1, %s603_s28  ;;  %s32_s25 = int_to_ptr.vmem [resolvable:$true] %s31_s25 }
   0x5   :  { %p607_p1 = scmp.lt.u32.totalorder %s603_s28, %s843_s1 }
   0x7   :  { %p609_p2 = pnand %p607_p1, %p604_p0 }
   0x9   :  { %612 = shalt.err (!%p609_p2)
}
   0xa   :  { %s613_s10 = scalar_lea.vmem %s32_s25, 512  ;;  %p618_p4 = scmp.lt.s32.totalorder %s32_s25, %s32_s25 }
   0xb   :  { %p614_p3 = scmp.ne.s32.totalorder %s32_s25, %s613_s10  ;;  %p619_p5 = scmp.lt.s32.totalorder %s613_s10, %s613_s10 }
   0xd   :  { %p620_p6 = por %p619_p5, %p618_p4 }
   0xf   :  { %p621_p7 = pnand %p620_p6, %p614_p3 }
  0x11   :  { %624 = shalt.err (!%p621_p7)
}
  0x12   :  { %s722_s11 = smov 128   ;;  %s723_s12 = smov 8  }
  0x13   :  { %37 = dma.hbm_to_vmem [thread:$0]  %s843_s1, 512, %s32_s25, [#allocation6], %s722_s11, %s722_s11, %s723_s12  }
  0x14   :  { %s724_s15 = smov [#allocation2]   ;;  %s725_s17 = smov [#allocation7]  }
  0x15   :  { %s22_s16 = sshll.u32 %s724_s15, 4  ;;  %s45_s18 = sshll.u32 %s725_s17, 4  ;;  %s23_s16 = int_to_ptr.vmem [resolvable:$true] %s22_s16  ;;  %s46_s18 = int_to_ptr.vmem [resolvable:$true] %s45_s18 }
  0x16   :  { %s625_s21 = scalar_lea.hbm %s842_s0, 64 }
  0x17   :  { %p626_p8 = scmp.ne.s32.totalorder %s842_s0, %s625_s21  ;;  %p629_p9 = scmp.lt.u32.totalorder %s625_s21, %s842_s0 }
  0x19   :  { %p631_p10 = pnand %p629_p9, %p626_p8 }
  0x1b   :  { %634 = shalt.err (!%p631_p10)
}
  0x1c   :  { %s635_s1 = scalar_lea.vmem %s23_s16, 64  ;;  %p640_p12 = scmp.lt.s32.totalorder %s23_s16, %s23_s16 }
  0x1d   :  { %p636_p11 = scmp.ne.s32.totalorder %s23_s16, %s635_s1  ;;  %p641_p13 = scmp.lt.s32.totalorder %s635_s1, %s635_s1 }
  0x1f   :  { %p642_p0 = por %p641_p13, %p640_p12 }
  0x21   :  { %p643_p1 = pnand %p642_p0, %p636_p11 }
  0x23   :  { %646 = shalt.err (!%p643_p1)
}
  0x24   :  { %25 = dma.hbm_to_vmem [thread:$0]  %s842_s0, 64, %s23_s16, [#allocation3]  }
  0x25   :  { %s647_s30 = scalar_lea.hbm %s845_s3, 2048 }
  0x26   :  { %p648_p2 = scmp.ne.s32.totalorder %s845_s3, %s647_s30  ;;  %p651_p3 = scmp.lt.u32.totalorder %s647_s30, %s845_s3 }
  0x28   :  { %p653_p4 = pnand %p651_p3, %p648_p2 }
  0x2a   :  { %656 = shalt.err (!%p653_p4)
}
  0x2b   :  { %s657_s12 = scalar_lea.vmem %s46_s18, 2048  ;;  %p662_p6 = scmp.lt.s32.totalorder %s46_s18, %s46_s18 }
  0x2c   :  { %p658_p5 = scmp.ne.s32.totalorder %s46_s18, %s657_s12  ;;  %p663_p7 = scmp.lt.s32.totalorder %s657_s12, %s657_s12 }
  0x2e   :  { %p664_p8 = por %p663_p7, %p662_p6 }
  0x30   :  { %p665_p9 = pnand %p664_p8, %p658_p5 }
  0x32   :  { %668 = shalt.err (!%p665_p9)
}
  0x33   :  { %s726_s0 = smov 64   ;;  %s727_s13 = smov 4  }
  0x34   :  { %51 = dma.hbm_to_vmem [thread:$0]  %s845_s3, 2048, %s46_s18, [#allocation6], %s726_s0, %s726_s0, %s727_s13  }
  0x35   :  { %s728_s16 = smov [#allocation8]   ;;  %s669_s21 = scalar_lea.hbm %s847_s5, 1024 }
  0x36   :  { %s59_s17 = sshll.u32 %s728_s16, 4  ;;  %p670_p10 = scmp.ne.s32.totalorder %s847_s5, %s669_s21  ;;  %s60_s17 = int_to_ptr.vmem [resolvable:$true] %s59_s17 }
  0x37   :  { %p673_p11 = scmp.lt.u32.totalorder %s669_s21, %s847_s5 }
  0x39   :  { %p675_p12 = pnand %p673_p11, %p670_p10 }
  0x3b   :  { %678 = shalt.err (!%p675_p12)
}
  0x3c   :  { %s679_s1 = scalar_lea.vmem %s60_s17, 1024  ;;  %p684_p0 = scmp.lt.s32.totalorder %s60_s17, %s60_s17 }
  0x3d   :  { %p680_p13 = scmp.ne.s32.totalorder %s60_s17, %s679_s1  ;;  %p685_p1 = scmp.lt.s32.totalorder %s679_s1, %s679_s1 }
  0x3f   :  { %p686_p2 = por %p685_p1, %p684_p0 }
  0x41   :  { %p687_p3 = pnand %p686_p2, %p680_p13 }
  0x43   :  { %690 = shalt.err (!%p687_p3)
}
  0x44   :  { %65 = dma.hbm_to_vmem [thread:$0]  %s847_s5, 1024, %s60_s17, [#allocation9], %s726_s0, %s726_s0, %s727_s13  }
  0x45   :  { %713 = dma.done.wait [#allocation3], 64  }
  0x46   :  { %714 = vsyncadd [#allocation3], 4294967232 }
  0x47   :  { %715 = dma.done.wait [#allocation6], 2560  }
  0x48   :  { %716 = vsyncadd [#allocation6], 4294964736 }
  0x49   :  { %717 = dma.done.wait [#allocation9], 1024  }
  0x4a   :  { %718 = vsyncadd [#allocation9], 4294966272  ;;  %v729_v0 = vmov 0   ;;  %v567_v1 = vld [vmem:[#allocation5 + $0x4] ss:$8 sps:$4 sm:$0xff]   ;;  %vm118_vm0 = vcmask 261120   ;;  %v88_v26 = vlaneseq }
  0x4b   :  { %154 = vmatprep.mubr.bf16.mxu0 %v729_v0  ;;  %v569_v2 = vld [vmem:[#allocation5] ss:$8 sps:$4 sm:$0xff]   ;;  %122 = vmatprep.subr.bf16.mxu0 %v567_v1  ;;  %v570_v3 = vld [vmem:[#allocation5 + $0x14] ss:$8 sps:$4 sm:$0xff]   ;;  %v572_v4 = vld [vmem:[#allocation5 + $0x10] ss:$8 sps:$4 sm:$0xff]  }
  0x4c   :  { %123 = vmatpush1.bf16.msra.mxu0 %v569_v2  ;;  %v573_v5 = vld [vmem:[#allocation7 + $0x40] sm:$0xff]   ;;  %v81_v7 = vld [vmem:[#allocation2] sm:$0xf]  ;;  %v575_v8 = vld [vmem:[#allocation7 + $0x48] sm:$0xff]   ;;  %v730_v23 = vmov 0.0   ;;  %v89_v27 = vshrl.u32 %v88_v26, 7 }
  0x4d   :  { %124 = vmatprep.subr.bf16.mxu0 %v570_v3  ;;  %v574_v6 = vld [vmem:[#allocation7] sm:$0xff]   ;;  %504 = vmatprep.subr.bf16.mxu1 %v573_v5  ;;  %v576_v9 = vld [vmem:[#allocation7 + $0x8] sm:$0xff]   ;;  %v577_v10 = vld [vmem:[#allocation7 + $0x50] sm:$0xff]   ;;  %vm731_vm1 = vmmov 0   ;;  %s732_s30 = smov [#allocation10]  }
  0x4e   :  { %505 = vmatpush3.bf16.msra.mxu1 %v574_v6  ;;  %v578_v11 = vld [vmem:[#allocation7 + $0x10] sm:$0xff]   ;;  %v579_v12 = vld [vmem:[#allocation7 + $0x58] sm:$0xff]   ;;  %v581_v14 = vld [vmem:[#allocation7 + $0x60] sm:$0xff]   ;;  %v90_v28 = vsub.s32 0, %v89_v27  ;;  %v94_v30 = vsub.s32 1, %v89_v27  ;;  %s462_s8 = sshll.u32 %s732_s30, 4  ;;  %s463_s8 = int_to_ptr.vmem [resolvable:$true] %s462_s8 }
  0x4f   :  { %506 = vmatprep.subr.bf16.mxu1 %v575_v8  ;;  %v580_v13 = vld [vmem:[#allocation7 + $0x18] sm:$0xff]   ;;  %v582_v15 = vld [vmem:[#allocation7 + $0x20] sm:$0xff]   ;;  %v583_v16 = vld [vmem:[#allocation7 + $0x68] sm:$0xff]   ;;  %p696_p5 = scmp.lt.s32.totalorder %s463_s8, %s463_s8 }
  0x50   :  { %125 = vmatpush1.bf16.msra.mxu0 %v572_v4  ;;  %v584_v17 = vld [vmem:[#allocation7 + $0x28] sm:$0xff]   ;;  %v585_v18 = vld [vmem:[#allocation7 + $0x70] sm:$0xff]   ;;  %v587_v20 = vld [vmem:[#allocation7 + $0x78] sm:$0xff]  }
  0x51   :  { %v586_v19 = vld [vmem:[#allocation7 + $0x30] sm:$0xff]   ;;  %v588_v21 = vld [vmem:[#allocation7 + $0x38] sm:$0xff]   ;;  %v589_v22 = vld [vmem:[#allocation8] sm:$0xff]   ;;  %535 = vmatprep.subr.bf16.mxu0 %v730_v23 }
  0x52   :  { %507 = vmatpush3.bf16.msra.mxu1 %v576_v9  ;;  %v590_v24 = vld [vmem:[#allocation8 + $0x8] sm:$0xff]   ;;  %v591_v25 = vld [vmem:[#allocation8 + $0x10] sm:$0xff]   ;;  %v86_v29 = vld [vmem:[%s844_s2] sm:$0x3] }
  0x53   :  { %477 = vmatmul.mubr.msk.bf16.vlgmr.msra.gmra.mrb[0].mxu0 %vm118_vm0, %v81_v7  ;;  %508 = vmatprep.subr.bf16.mxu1 %v577_v10  ;;  %v91_v31 = vrot.slane %v86_v29, %v90_v28  ;;  %v95_v32 = vrot.slane %v86_v29, %v94_v30  ;;  %v592_v43 = vld [vmem:[#allocation8 + $0x18] sm:$0xff]   ;;  %v593_v44 = vld [vmem:[#allocation8 + $0x20] sm:$0xff]   ;;  %v594_v45 = vld [vmem:[#allocation8 + $0x28] sm:$0xff]  }
  0x54   :  { %536 = vmatpush3.bf16.msra.mxu0 %v589_v22  ;;  %v595_v46 = vld [vmem:[#allocation8 + $0x30] sm:$0xff]   ;;  %v596_v47 = vld [vmem:[#allocation8 + $0x38] sm:$0xff]   ;;  %551 = vmatprep.mubr.msk.bf16.mxu0 %vm731_vm1, %v730_v23 }
  0x55   :  { %537 = vmatprep.subr.bf16.mxu0 %v730_v23  ;;  %v478_v49 = vld [vmem:[%s846_s4] ss:$0 sm:$0xff]  ;;  %s691_s4 = scalar_lea.vmem %s463_s8, 128 }
  0x56   :  { %509 = vmatpush3.bf16.msra.mxu1 %v578_v11  ;;  %v495_v57 = vld [vmem:[%s848_s6] ss:$0 sm:$0xff]  ;;  %p692_p4 = scmp.ne.s32.totalorder %s463_s8, %s691_s4  ;;  %p697_p6 = scmp.lt.s32.totalorder %s691_s4, %s691_s4 }
  0x57   :  { %510 = vmatprep.subr.bf16.mxu1 %v579_v12 }
  0x58   :  { %538 = vmatpush3.bf16.msra.mxu0 %v590_v24  ;;  %p698_p7 = por %p697_p6, %p696_p5 }
  0x59   :  { %539 = vmatprep.subr.bf16.mxu0 %v730_v23 }
  0x5a   :  { %511 = vmatpush3.bf16.msra.mxu1 %v580_v13  ;;  %p699_p8 = pnand %p698_p7, %p692_p4 }
  0x5b   :  { %512 = vmatprep.subr.bf16.mxu1 %v581_v14 }
  0x5c   :  { %540 = vmatpush3.bf16.msra.mxu0 %v591_v25 }
  0x5d   :  { %541 = vmatprep.subr.bf16.mxu0 %v730_v23 }
  0x5e   :  { %513 = vmatpush3.bf16.msra.mxu1 %v582_v15 }
  0x5f   :  { %514 = vmatprep.subr.bf16.mxu1 %v583_v16 }
  0x60   :  { %542 = vmatpush3.bf16.msra.mxu0 %v592_v43 }
  0x61   :  { %543 = vmatprep.subr.bf16.mxu0 %v730_v23 }
  0x62   :  { %515 = vmatpush3.bf16.msra.mxu1 %v584_v17 }
  0x63   :  { %516 = vmatprep.subr.bf16.mxu1 %v585_v18 }
  0x64   :  { %544 = vmatpush3.bf16.msra.mxu0 %v593_v44 }
  0x65   :  { %545 = vmatprep.subr.bf16.mxu0 %v730_v23 }
  0x66   :  { %517 = vmatpush3.bf16.msra.mxu1 %v586_v19 }
  0x67   :  { %518 = vmatprep.subr.bf16.mxu1 %v587_v20 }
  0x68   :  { %546 = vmatpush3.bf16.msra.mxu0 %v594_v45 }
  0x69   :  { %547 = vmatprep.subr.bf16.mxu0 %v730_v23 }
  0x6a   :  { %519 = vmatpush3.bf16.msra.mxu1 %v588_v21 }
  0x6c   :  { %548 = vmatpush3.bf16.msra.mxu0 %v595_v46 }
  0x6d   :  { %549 = vmatprep.subr.bf16.mxu0 %v730_v23 }
  0x70   :  { %550 = vmatpush3.bf16.msra.mxu0 %v596_v47 }
 0x126   :  { %v156_v33 = vpop.f32.mrb[0].mxu0 }
 0x127   :  { %v157_v34 = vadd.f32 %v156_v33, %v91_v31  ;;  %v158_v35 = vpop.f32.mrb[1].mxu0 }
 0x128   :  { %v159_v36 = vadd.f32 %v158_v35, %v95_v32  ;;  %v160_v37 = vpop.f32.mrb[2].mxu0 }
 0x129   :  { %597 = vtanh.f32 %v157_v34  ;;  %v161_v38 = vpop.f32.mrb[3].mxu0 }
 0x12a   :  { %599 = vtanh.f32 %v159_v36 }
 0x133   :  { %v598_v39 = vpop.eup %597 }
 0x134   :  { %v600_v40 = vpop.eup %599  ;;  %v165_v42 = vpack.c.bf16 %v598_v39, %v598_v39 }
 0x135   :  { %v166_v41 = vpack.c.bf16 %v600_v40, %v600_v40 }
 0x137   :  { %334 = vmatprep.mubr.bf16.mxu1 %v166_v41 }
 0x138   :  { %335 = vmatmul.mubr.bf16.vlgmr.msra.gmra.mrb[0].mxu1 %v165_v42 }
 0x20b   :  { %v520_v48 = vpop.f32.mrb[0].mxu1 }
 0x20c   :  { %v521_v50 = vpop.f32.mrb[1].mxu1 }
 0x20d   :  { %v522_v51 = vadd.f32 %v521_v50, %v520_v48  ;;  %v523_v52 = vpop.f32.mrb[2].mxu1 }
 0x20e   :  { %v524_v53 = vpop.f32.mrb[3].mxu1 }
 0x20f   :  { %v337_v54 = vadd.f32 %v522_v51, %v478_v49 }
 0x211   :  { %601 = vtanh.f32 %v337_v54 }
 0x21b   :  { %v602_v55 = vpop.eup %601 }
 0x21c   :  { %v343_v56 = vpack.c.bf16 %v602_v55, %v602_v55 }
 0x21e   :  { %552 = vmatmul.mubr.bf16.vlgmr.msra.gmra.mrb[4].mxu0 %v343_v56 }
 0x2f1   :  { %v449_v58 = vpop.f32.mrb[4].mxu0 }
 0x2f2   :  { %v450_v59 = vadd.f32 %v495_v57, %v449_v58  ;;  %v553_v60 = vpop.f32.mrb[5].mxu0 }
 0x2f3   :  { %v452_v61 = vpop.f32.mrb[6].mxu0 }
 0x2f4   :  { %455 = vst [vmem:[#allocation10] sm:$0xff] %v450_v59  ;;  %v554_v62 = vpop.f32.mrb[7].mxu0 }
 0x2f5   :  { %702 = shalt.err (!%p699_p8)
}
 0x2f6   :  { %s703_s6 = scalar_lea.hbm %s849_s7, 128 }
 0x2f7   :  { %p704_p9 = scmp.ne.s32.totalorder %s849_s7, %s703_s6  ;;  %p707_p10 = scmp.lt.u32.totalorder %s703_s6, %s849_s7 }
 0x2f9   :  { %p709_p11 = pnand %p707_p10, %p704_p9 }
 0x2fb   :  { %712 = shalt.err (!%p709_p11)
}
 0x2fc   :  { %465 = dma.vmem_to_hbm [thread:$0]  %s463_s8, 128, %s849_s7, [#allocation4]  }
 0x2fd   :  { %719 = dma.done.wait [#allocation4], 128  }
 0x2fe   :  { %720 = vsyncadd [#allocation4], 4294967168 }
 0x2ff   :  { %469 = vsyncpa [#allocation3], 1 }
 0x300   :  { %470 = vsyncpa [#allocation6], 1 }
 0x301   :  { %471 = vsyncpa [#allocation9], 1 }
 0x302   :  { %472 = vsyncpa [#allocation4], 1 }

</bundles_post_ra>
